<compile_context>
chip_gen: v5e
topology: v5e:2x2
jax: 0.10.0
libtpu: 0.0.40
codegen_flags: <defaults>
</compile_context>

<pallas_src>
import jax
import jax.numpy as jnp
from jax import lax
from jax.experimental import pallas as pl
from jax.experimental.pallas import tpu as pltpu


def _round_up(x, m):
    return ((x + m - 1) // m) * m


def _resident_gather_kernel(bt, D, unroll):
    """All three tables VMEM-resident; pure on-chip per-row gather."""

    def kernel(h_idx, r_idx, t_idx, ts_idx,     # scalar-prefetch index vectors (SMEM)
               ent_ref, rel_ref, ts_ref,        # full tables, resident in VMEM
               out_ref):                        # (bt, 4*D) merged output block
        base = pl.program_id(0) * bt

        def body(r, carry):
            b = base + r
            out_ref[pl.ds(r, 1), 0 * D:1 * D] = ent_ref[pl.ds(h_idx[b], 1), :]
            out_ref[pl.ds(r, 1), 1 * D:2 * D] = rel_ref[pl.ds(r_idx[b], 1), :]
            out_ref[pl.ds(r, 1), 2 * D:3 * D] = ent_ref[pl.ds(t_idx[b], 1), :]
            out_ref[pl.ds(r, 1), 3 * D:4 * D] = ts_ref[pl.ds(ts_idx[b], 1), :]
            return carry

        lax.fori_loop(0, bt, body, 0, unroll=unroll)

    return kernel


def _dma_entity_gather_kernel(bt, D, B, unroll):
    """Entity table stays in HBM (too large for VMEM): head/tail rows are gathered
    by DMA into VMEM staging buffers, while the small relation/timestamp tables are
    VMEM-resident and gathered on-chip overlapping with the entity-row DMAs."""

    def kernel(h_idx, r_idx, t_idx, ts_idx,
               ent_hbm, rel_ref, ts_ref,
               out_ref,
               head_buf, tail_buf, sems):
        base = pl.program_id(0) * bt

        # 1) Launch all (valid-row) entity DMAs on two shared semaphores (all in flight).
        def start(r, carry):
            b = base + r

            @pl.when(b < B)                       # skip DMAs for padded tail rows
            def _():
                pltpu.make_async_copy(ent_hbm.at[pl.ds(h_idx[b], 1), :],
                                      head_buf.at[pl.ds(r, 1), :], sems.at[0]).start()
                pltpu.make_async_copy(ent_hbm.at[pl.ds(t_idx[b], 1), :],
                                      tail_buf.at[pl.ds(r, 1), :], sems.at[1]).start()
            return carry

        lax.fori_loop(0, bt, start, 0, unroll=unroll)

        # 2) On-chip gather of the resident rel/ts tables overlaps the entity DMAs.
        def relts(r, carry):
            b = base + r
            out_ref[pl.ds(r, 1), 1 * D:2 * D] = rel_ref[pl.ds(r_idx[b], 1), :]
            out_ref[pl.ds(r, 1), 3 * D:4 * D] = ts_ref[pl.ds(ts_idx[b], 1), :]
            return carry

        lax.fori_loop(0, bt, relts, 0, unroll=unroll)

        # 3) Wait for every started entity DMA (same-shaped placeholder descriptors on
        #    the shared sems).  All copies complete before the block is written back,
        #    so the pipeline's HBM writeback can never race the gather DMAs.
        def wait(r, carry):
            @pl.when(base + r < B)
            def _():
                pltpu.make_async_copy(ent_hbm.at[pl.ds(0, 1), :],
                                      head_buf.at[pl.ds(0, 1), :], sems.at[0]).wait()
                pltpu.make_async_copy(ent_hbm.at[pl.ds(0, 1), :],
                                      tail_buf.at[pl.ds(0, 1), :], sems.at[1]).wait()
            return carry

        lax.fori_loop(0, bt, wait, 0)

        # 4) Move the staged entity rows into the merged lane-dense output slab.
        out_ref[:, 0 * D:1 * D] = head_buf[...]
        out_ref[:, 2 * D:3 * D] = tail_buf[...]

    return kernel


def tkg_embedding_forward(entity_emb, relation_emb, timestamp_emb,
                          head, relation, tail, timestamp,
                          *, block_rows=32, unroll=8,
                          entity_resident_max_bytes=16 * 1024 * 1024):
    """Pallas implementation of PretrainedTKGEmbeddingWithTimestamps.forward."""
    if block_rows % 8 != 0:
        raise ValueError("block_rows must be a multiple of 8 (TPU sublane tiling)")

    B = head.shape[0]
    _, D = entity_emb.shape
    dtype = entity_emb.dtype
    itemsize = jnp.dtype(dtype).itemsize

    # Rows per grid step: multiple of 8, capped at block_rows, and chosen so the
    # grid has >= 2 steps when the batch allows it (lets v7x's two TensorCores
    # both get work; a no-op on single-TC v5e/v6e).
    bt = min(block_rows, _round_up(B, 8))
    if B > 8 and pl.cdiv(B, bt) < 2:
        bt = max(8, _round_up(pl.cdiv(B, 2), 8))
    num_blocks = pl.cdiv(B, bt)
    B_pad = num_blocks * bt

    def prep(idx):
        idx = idx.astype(jnp.int32)
        if B_pad != B:
            idx = jnp.pad(idx, (0, B_pad - B))    # padded rows gather row 0 (sliced off)
        return idx

    head_p, rel_p, tail_p, ts_p = (prep(i) for i in (head, relation, tail, timestamp))

    ent_bytes = entity_emb.size * itemsize
    small_bytes = (relation_emb.size + timestamp_emb.size) * itemsize
    out_buf_bytes = 2 * bt * 4 * D * itemsize     # double-buffered merged output block

    # TODO(synk): re-derive the residency threshold per generation (v5e/v6e can take
    # ~90 MB, v7x only ~40 MB); 16 MiB default is conservative everywhere.
    entity_resident = ent_bytes <= entity_resident_max_bytes

    def full_spec(shape):
        return pl.BlockSpec(shape, lambda i, *_: (0, 0))   # whole table, VMEM-resident

    out_spec = pl.BlockSpec((bt, 4 * D), lambda i, *_: (i, 0))

    if entity_resident:
        kernel = _resident_gather_kernel(bt, D, unroll)
        in_specs = [full_spec(entity_emb.shape),
                    full_spec(relation_emb.shape),
                    full_spec(timestamp_emb.shape)]
        scratch_shapes = []
        vmem_needed = 2 * (ent_bytes + small_bytes) + out_buf_bytes
    else:
        kernel = _dma_entity_gather_kernel(bt, D, B, unroll)
        in_specs = [pl.BlockSpec(memory_space=pl.ANY),      # entity table stays in HBM
                    full_spec(relation_emb.shape),
                    full_spec(timestamp_emb.shape)]
        scratch_shapes = [pltpu.VMEM((bt, D), dtype),        # head rows staging
                          pltpu.VMEM((bt, D), dtype),        # tail rows staging
                          pltpu.SemaphoreType.DMA((2,))]     # 2 shared sems, not 4*bt
        vmem_needed = 2 * small_bytes + out_buf_bytes + 2 * bt * D * itemsize

    vmem_limit = int(min(96 * 2 ** 20, max(32 * 2 ** 20, vmem_needed + (8 << 20))))

    grid_spec = pltpu.PrefetchScalarGridSpec(
        num_scalar_prefetch=4,                    # head/rel/tail/ts index vectors -> SMEM
        grid=(num_blocks,),
        in_specs=in_specs,
        out_specs=out_spec,
        scratch_shapes=scratch_shapes)

    out = pl.pallas_call(
        kernel,
        grid_spec=grid_spec,
        out_shape=jax.ShapeDtypeStruct((B_pad, 4 * D), dtype),
        compiler_params=pltpu.CompilerParams(
            dimension_semantics=("parallel",),    # distinct output block per step
            vmem_limit_bytes=vmem_limit),
    )(head_p, rel_p, tail_p, ts_p, entity_emb, relation_emb, timestamp_emb)

    out = out[:B]
    return (out[:, 0 * D:1 * D],     # head_emb
            out[:, 1 * D:2 * D],     # relation_emb
            out[:, 2 * D:3 * D],     # tail_emb
            out[:, 3 * D:4 * D])     # timestamp_emb


if __name__ == "__main__":
    # Small synthetic configuration consistent with the module's __init__.
    num_entities = 32
    num_relations = 8
    num_timestamps = 16
    embedding_dim = 128              # multiple of 128 -> lane-dense blocks

    key = jax.random.PRNGKey(0)
    k_ent, k_rel, k_ts = jax.random.split(key, 3)

    # Deterministic "pretrained" weights (nn.Embedding default: N(0, 1)).
    entity_emb = jax.random.normal(k_ent, (num_entities, embedding_dim), jnp.float32)
    relation_emb = jax.random.normal(k_rel, (num_relations, embedding_dim), jnp.float32)
    timestamp_emb = jax.random.normal(k_ts, (num_timestamps, embedding_dim), jnp.float32)

    def run_and_check(batch, **kwargs):
        kh, kr, kt, kts = jax.random.split(jax.random.fold_in(key, batch), 4)
        head = jax.random.randint(kh, (batch,), 0, num_entities, jnp.int32)
        relation = jax.random.randint(kr, (batch,), 0, num_relations, jnp.int32)
        tail = jax.random.randint(kt, (batch,), 0, num_entities, jnp.int32)
        timestamp = jax.random.randint(kts, (batch,), 0, num_timestamps, jnp.int32)

        outs = jax.block_until_ready(
            tkg_embedding_forward(entity_emb, relation_emb, timestamp_emb,
                                  head, relation, tail, timestamp, **kwargs))

        refs = (jnp.take(entity_emb, head, axis=0),
                jnp.take(relation_emb, relation, axis=0),
                jnp.take(entity_emb, tail, axis=0),
                jnp.take(timestamp_emb, timestamp, axis=0))
        for o, r in zip(outs, refs):
            assert o.shape == (batch, embedding_dim) and o.dtype == jnp.float32
            assert jnp.array_equal(o, r), "gather mismatch"

    run_and_check(8)                                   # single block, VMEM-resident tables
    run_and_check(20)                                  # multi-step grid + padded tail rows
    run_and_check(20, entity_resident_max_bytes=0)     # forced HBM DMA-gather entity path

    print("KERNEL_OK")
</pallas_src>

<mosaic_0001>
module attributes {stable_mosaic.version = 11 : i64} {
  func.func @kernel(%arg0: i32, %arg1: memref<8xi32, #tpu.memory_space<smem>>, %arg2: memref<8xi32, #tpu.memory_space<smem>>, %arg3: memref<8xi32, #tpu.memory_space<smem>>, %arg4: memref<8xi32, #tpu.memory_space<smem>>, %arg5: memref<32x128xf32, #tpu.memory_space<vmem>>, %arg6: memref<8x128xf32, #tpu.memory_space<vmem>>, %arg7: memref<16x128xf32, #tpu.memory_space<vmem>>, %arg8: memref<8x512xf32, #tpu.memory_space<vmem>>) attributes {dimension_semantics = [#tpu.dimension_semantics<parallel>], iteration_bounds = array<i64: 1>, scalar_prefetch = 4 : i64, scratch_operands = 0 : i64, tpu.core_type = #tpu.core_type<tc>, window_params = [{pipeline_mode = #tpu.pipeline_mode<synchronous>, transform_indices = @transform_0, window_bounds = array<i64: 32, 128>}, {pipeline_mode = #tpu.pipeline_mode<synchronous>, transform_indices = @transform_1, window_bounds = array<i64: 8, 128>}, {pipeline_mode = #tpu.pipeline_mode<synchronous>, transform_indices = @transform_2, window_bounds = array<i64: 16, 128>}, {transform_indices = @transform_3, window_bounds = array<i64: 8, 512>}]} {
    %c8_i32 = arith.constant 8 : i32
    %0 = arith.muli %arg0, %c8_i32 : i32
    %c0_i32 = arith.constant 0 : i32
    %1 = arith.addi %0, %c0_i32 : i32
    %2 = arith.index_cast %1 : i32 to index
    %3 = memref.load %arg1[%2] : memref<8xi32, #tpu.memory_space<smem>>
    %4 = arith.index_cast %3 : i32 to index
    %c0 = arith.constant 0 : index
    %5 = vector.load %arg5[%4, %c0] : memref<32x128xf32, #tpu.memory_space<vmem>>, vector<1x128xf32>
    %6 = arith.index_cast %c0_i32 : i32 to index
    %c0_0 = arith.constant 0 : index
    %7 = vector.load %arg8[%6, %c0_0] : memref<8x512xf32, #tpu.memory_space<vmem>>, vector<1x128xf32>
    tpu.vector_store %arg8[%6, %c0_0], %5 {strides = array<i32>} : memref<8x512xf32, #tpu.memory_space<vmem>>, vector<1x128xf32>,
    %8 = arith.index_cast %1 : i32 to index
    %9 = memref.load %arg2[%8] : memref<8xi32, #tpu.memory_space<smem>>
    %10 = arith.index_cast %9 : i32 to index
    %c0_1 = arith.constant 0 : index
    %11 = vector.load %arg6[%10, %c0_1] : memref<8x128xf32, #tpu.memory_space<vmem>>, vector<1x128xf32>
    %12 = arith.index_cast %c0_i32 : i32 to index
    %c128 = arith.constant 128 : index
    %13 = vector.load %arg8[%12, %c128] : memref<8x512xf32, #tpu.memory_space<vmem>>, vector<1x128xf32>
    tpu.vector_store %arg8[%12, %c128], %11 {strides = array<i32>} : memref<8x512xf32, #tpu.memory_space<vmem>>, vector<1x128xf32>,
    %14 = arith.index_cast %1 : i32 to index
    %15 = memref.load %arg3[%14] : memref<8xi32, #tpu.memory_space<smem>>
    %16 = arith.index_cast %15 : i32 to index
    %c0_2 = arith.constant 0 : index
    %17 = vector.load %arg5[%16, %c0_2] : memref<32x128xf32, #tpu.memory_space<vmem>>, vector<1x128xf32>
    %18 = arith.index_cast %c0_i32 : i32 to index
    %c256 = arith.constant 256 : index
    %19 = vector.load %arg8[%18, %c256] : memref<8x512xf32, #tpu.memory_space<vmem>>, vector<1x128xf32>
    tpu.vector_store %arg8[%18, %c256], %17 {strides = array<i32>} : memref<8x512xf32, #tpu.memory_space<vmem>>, vector<1x128xf32>,
    %20 = arith.index_cast %1 : i32 to index
    %21 = memref.load %arg4[%20] : memref<8xi32, #tpu.memory_space<smem>>
    %22 = arith.index_cast %21 : i32 to index
    %c0_3 = arith.constant 0 : index
    %23 = vector.load %arg7[%22, %c0_3] : memref<16x128xf32, #tpu.memory_space<vmem>>, vector<1x128xf32>
    %24 = arith.index_cast %c0_i32 : i32 to index
    %c384 = arith.constant 384 : index
    %25 = vector.load %arg8[%24, %c384] : memref<8x512xf32, #tpu.memory_space<vmem>>, vector<1x128xf32>
    tpu.vector_store %arg8[%24, %c384], %23 {strides = array<i32>} : memref<8x512xf32, #tpu.memory_space<vmem>>, vector<1x128xf32>,
    %c1_i32 = arith.constant 1 : i32
    %26 = arith.addi %0, %c1_i32 : i32
    %27 = arith.index_cast %26 : i32 to index
    %28 = memref.load %arg1[%27] : memref<8xi32, #tpu.memory_space<smem>>
    %29 = arith.index_cast %28 : i32 to index
    %c0_4 = arith.constant 0 : index
    %30 = vector.load %arg5[%29, %c0_4] : memref<32x128xf32, #tpu.memory_space<vmem>>, vector<1x128xf32>
    %31 = arith.index_cast %c1_i32 : i32 to index
    %c0_5 = arith.constant 0 : index
    %32 = vector.load %arg8[%31, %c0_5] : memref<8x512xf32, #tpu.memory_space<vmem>>, vector<1x128xf32>
    tpu.vector_store %arg8[%31, %c0_5], %30 {strides = array<i32>} : memref<8x512xf32, #tpu.memory_space<vmem>>, vector<1x128xf32>,
    %33 = arith.index_cast %26 : i32 to index
    %34 = memref.load %arg2[%33] : memref<8xi32, #tpu.memory_space<smem>>
    %35 = arith.index_cast %34 : i32 to index
    %c0_6 = arith.constant 0 : index
    %36 = vector.load %arg6[%35, %c0_6] : memref<8x128xf32, #tpu.memory_space<vmem>>, vector<1x128xf32>
    %37 = arith.index_cast %c1_i32 : i32 to index
    %c128_7 = arith.constant 128 : index
    %38 = vector.load %arg8[%37, %c128_7] : memref<8x512xf32, #tpu.memory_space<vmem>>, vector<1x128xf32>
    tpu.vector_store %arg8[%37, %c128_7], %36 {strides = array<i32>} : memref<8x512xf32, #tpu.memory_space<vmem>>, vector<1x128xf32>,
    %39 = arith.index_cast %26 : i32 to index
    %40 = memref.load %arg3[%39] : memref<8xi32, #tpu.memory_space<smem>>
    %41 = arith.index_cast %40 : i32 to index
    %c0_8 = arith.constant 0 : index
    %42 = vector.load %arg5[%41, %c0_8] : memref<32x128xf32, #tpu.memory_space<vmem>>, vector<1x128xf32>
    %43 = arith.index_cast %c1_i32 : i32 to index
    %c256_9 = arith.constant 256 : index
    %44 = vector.load %arg8[%43, %c256_9] : memref<8x512xf32, #tpu.memory_space<vmem>>, vector<1x128xf32>
    tpu.vector_store %arg8[%43, %c256_9], %42 {strides = array<i32>} : memref<8x512xf32, #tpu.memory_space<vmem>>, vector<1x128xf32>,
    %45 = arith.index_cast %26 : i32 to index
    %46 = memref.load %arg4[%45] : memref<8xi32, #tpu.memory_space<smem>>
    %47 = arith.index_cast %46 : i32 to index
    %c0_10 = arith.constant 0 : index
    %48 = vector.load %arg7[%47, %c0_10] : memref<16x128xf32, #tpu.memory_space<vmem>>, vector<1x128xf32>
    %49 = arith.index_cast %c1_i32 : i32 to index
    %c384_11 = arith.constant 384 : index
    %50 = vector.load %arg8[%49, %c384_11] : memref<8x512xf32, #tpu.memory_space<vmem>>, vector<1x128xf32>
    tpu.vector_store %arg8[%49, %c384_11], %48 {strides = array<i32>} : memref<8x512xf32, #tpu.memory_space<vmem>>, vector<1x128xf32>,
    %c2_i32 = arith.constant 2 : i32
    %51 = arith.addi %0, %c2_i32 : i32
    %52 = arith.index_cast %51 : i32 to index
    %53 = memref.load %arg1[%52] : memref<8xi32, #tpu.memory_space<smem>>
    %54 = arith.index_cast %53 : i32 to index
    %c0_12 = arith.constant 0 : index
    %55 = vector.load %arg5[%54, %c0_12] : memref<32x128xf32, #tpu.memory_space<vmem>>, vector<1x128xf32>
    %56 = arith.index_cast %c2_i32 : i32 to index
    %c0_13 = arith.constant 0 : index
    %57 = vector.load %arg8[%56, %c0_13] : memref<8x512xf32, #tpu.memory_space<vmem>>, vector<1x128xf32>
    tpu.vector_store %arg8[%56, %c0_13], %55 {strides = array<i32>} : memref<8x512xf32, #tpu.memory_space<vmem>>, vector<1x128xf32>,
    %58 = arith.index_cast %51 : i32 to index
    %59 = memref.load %arg2[%58] : memref<8xi32, #tpu.memory_space<smem>>
    %60 = arith.index_cast %59 : i32 to index
    %c0_14 = arith.constant 0 : index
    %61 = vector.load %arg6[%60, %c0_14] : memref<8x128xf32, #tpu.memory_space<vmem>>, vector<1x128xf32>
    %62 = arith.index_cast %c2_i32 : i32 to index
    %c128_15 = arith.constant 128 : index
    %63 = vector.load %arg8[%62, %c128_15] : memref<8x512xf32, #tpu.memory_space<vmem>>, vector<1x128xf32>
    tpu.vector_store %arg8[%62, %c128_15], %61 {strides = array<i32>} : memref<8x512xf32, #tpu.memory_space<vmem>>, vector<1x128xf32>,
    %64 = arith.index_cast %51 : i32 to index
    %65 = memref.load %arg3[%64] : memref<8xi32, #tpu.memory_space<smem>>
    %66 = arith.index_cast %65 : i32 to index
    %c0_16 = arith.constant 0 : index
    %67 = vector.load %arg5[%66, %c0_16] : memref<32x128xf32, #tpu.memory_space<vmem>>, vector<1x128xf32>
    %68 = arith.index_cast %c2_i32 : i32 to index
    %c256_17 = arith.constant 256 : index
    %69 = vector.load %arg8[%68, %c256_17] : memref<8x512xf32, #tpu.memory_space<vmem>>, vector<1x128xf32>
    tpu.vector_store %arg8[%68, %c256_17], %67 {strides = array<i32>} : memref<8x512xf32, #tpu.memory_space<vmem>>, vector<1x128xf32>,
    %70 = arith.index_cast %51 : i32 to index
    %71 = memref.load %arg4[%70] : memref<8xi32, #tpu.memory_space<smem>>
    %72 = arith.index_cast %71 : i32 to index
    %c0_18 = arith.constant 0 : index
    %73 = vector.load %arg7[%72, %c0_18] : memref<16x128xf32, #tpu.memory_space<vmem>>, vector<1x128xf32>
    %74 = arith.index_cast %c2_i32 : i32 to index
    %c384_19 = arith.constant 384 : index
    %75 = vector.load %arg8[%74, %c384_19] : memref<8x512xf32, #tpu.memory_space<vmem>>, vector<1x128xf32>
    tpu.vector_store %arg8[%74, %c384_19], %73 {strides = array<i32>} : memref<8x512xf32, #tpu.memory_space<vmem>>, vector<1x128xf32>,
    %c3_i32 = arith.constant 3 : i32
    %76 = arith.addi %0, %c3_i32 : i32
    %77 = arith.index_cast %76 : i32 to index
    %78 = memref.load %arg1[%77] : memref<8xi32, #tpu.memory_space<smem>>
    %79 = arith.index_cast %78 : i32 to index
    %c0_20 = arith.constant 0 : index
    %80 = vector.load %arg5[%79, %c0_20] : memref<32x128xf32, #tpu.memory_space<vmem>>, vector<1x128xf32>
    %81 = arith.index_cast %c3_i32 : i32 to index
    %c0_21 = arith.constant 0 : index
    %82 = vector.load %arg8[%81, %c0_21] : memref<8x512xf32, #tpu.memory_space<vmem>>, vector<1x128xf32>
    tpu.vector_store %arg8[%81, %c0_21], %80 {strides = array<i32>} : memref<8x512xf32, #tpu.memory_space<vmem>>, vector<1x128xf32>,
    %83 = arith.index_cast %76 : i32 to index
    %84 = memref.load %arg2[%83] : memref<8xi32, #tpu.memory_space<smem>>
    %85 = arith.index_cast %84 : i32 to index
    %c0_22 = arith.constant 0 : index
    %86 = vector.load %arg6[%85, %c0_22] : memref<8x128xf32, #tpu.memory_space<vmem>>, vector<1x128xf32>
    %87 = arith.index_cast %c3_i32 : i32 to index
    %c128_23 = arith.constant 128 : index
    %88 = vector.load %arg8[%87, %c128_23] : memref<8x512xf32, #tpu.memory_space<vmem>>, vector<1x128xf32>
    tpu.vector_store %arg8[%87, %c128_23], %86 {strides = array<i32>} : memref<8x512xf32, #tpu.memory_space<vmem>>, vector<1x128xf32>,
    %89 = arith.index_cast %76 : i32 to index
    %90 = memref.load %arg3[%89] : memref<8xi32, #tpu.memory_space<smem>>
    %91 = arith.index_cast %90 : i32 to index
    %c0_24 = arith.constant 0 : index
    %92 = vector.load %arg5[%91, %c0_24] : memref<32x128xf32, #tpu.memory_space<vmem>>, vector<1x128xf32>
    %93 = arith.index_cast %c3_i32 : i32 to index
    %c256_25 = arith.constant 256 : index
    %94 = vector.load %arg8[%93, %c256_25] : memref<8x512xf32, #tpu.memory_space<vmem>>, vector<1x128xf32>
    tpu.vector_store %arg8[%93, %c256_25], %92 {strides = array<i32>} : memref<8x512xf32, #tpu.memory_space<vmem>>, vector<1x128xf32>,
    %95 = arith.index_cast %76 : i32 to index
    %96 = memref.load %arg4[%95] : memref<8xi32, #tpu.memory_space<smem>>
    %97 = arith.index_cast %96 : i32 to index
    %c0_26 = arith.constant 0 : index
    %98 = vector.load %arg7[%97, %c0_26] : memref<16x128xf32, #tpu.memory_space<vmem>>, vector<1x128xf32>
    %99 = arith.index_cast %c3_i32 : i32 to index
    %c384_27 = arith.constant 384 : index
    %100 = vector.load %arg8[%99, %c384_27] : memref<8x512xf32, #tpu.memory_space<vmem>>, vector<1x128xf32>
    tpu.vector_store %arg8[%99, %c384_27], %98 {strides = array<i32>} : memref<8x512xf32, #tpu.memory_space<vmem>>, vector<1x128xf32>,
    %c4_i32 = arith.constant 4 : i32
    %101 = arith.addi %0, %c4_i32 : i32
    %102 = arith.index_cast %101 : i32 to index
    %103 = memref.load %arg1[%102] : memref<8xi32, #tpu.memory_space<smem>>
    %104 = arith.index_cast %103 : i32 to index
    %c0_28 = arith.constant 0 : index
    %105 = vector.load %arg5[%104, %c0_28] : memref<32x128xf32, #tpu.memory_space<vmem>>, vector<1x128xf32>
    %106 = arith.index_cast %c4_i32 : i32 to index
    %c0_29 = arith.constant 0 : index
    %107 = vector.load %arg8[%106, %c0_29] : memref<8x512xf32, #tpu.memory_space<vmem>>, vector<1x128xf32>
    tpu.vector_store %arg8[%106, %c0_29], %105 {strides = array<i32>} : memref<8x512xf32, #tpu.memory_space<vmem>>, vector<1x128xf32>,
    %108 = arith.index_cast %101 : i32 to index
    %109 = memref.load %arg2[%108] : memref<8xi32, #tpu.memory_space<smem>>
    %110 = arith.index_cast %109 : i32 to index
    %c0_30 = arith.constant 0 : index
    %111 = vector.load %arg6[%110, %c0_30] : memref<8x128xf32, #tpu.memory_space<vmem>>, vector<1x128xf32>
    %112 = arith.index_cast %c4_i32 : i32 to index
    %c128_31 = arith.constant 128 : index
    %113 = vector.load %arg8[%112, %c128_31] : memref<8x512xf32, #tpu.memory_space<vmem>>, vector<1x128xf32>
    tpu.vector_store %arg8[%112, %c128_31], %111 {strides = array<i32>} : memref<8x512xf32, #tpu.memory_space<vmem>>, vector<1x128xf32>,
    %114 = arith.index_cast %101 : i32 to index
    %115 = memref.load %arg3[%114] : memref<8xi32, #tpu.memory_space<smem>>
    %116 = arith.index_cast %115 : i32 to index
    %c0_32 = arith.constant 0 : index
    %117 = vector.load %arg5[%116, %c0_32] : memref<32x128xf32, #tpu.memory_space<vmem>>, vector<1x128xf32>
    %118 = arith.index_cast %c4_i32 : i32 to index
    %c256_33 = arith.constant 256 : index
    %119 = vector.load %arg8[%118, %c256_33] : memref<8x512xf32, #tpu.memory_space<vmem>>, vector<1x128xf32>
    tpu.vector_store %arg8[%118, %c256_33], %117 {strides = array<i32>} : memref<8x512xf32, #tpu.memory_space<vmem>>, vector<1x128xf32>,
    %120 = arith.index_cast %101 : i32 to index
    %121 = memref.load %arg4[%120] : memref<8xi32, #tpu.memory_space<smem>>
    %122 = arith.index_cast %121 : i32 to index
    %c0_34 = arith.constant 0 : index
    %123 = vector.load %arg7[%122, %c0_34] : memref<16x128xf32, #tpu.memory_space<vmem>>, vector<1x128xf32>
    %124 = arith.index_cast %c4_i32 : i32 to index
    %c384_35 = arith.constant 384 : index
    %125 = vector.load %arg8[%124, %c384_35] : memref<8x512xf32, #tpu.memory_space<vmem>>, vector<1x128xf32>
    tpu.vector_store %arg8[%124, %c384_35], %123 {strides = array<i32>} : memref<8x512xf32, #tpu.memory_space<vmem>>, vector<1x128xf32>,
    %c5_i32 = arith.constant 5 : i32
    %126 = arith.addi %0, %c5_i32 : i32
    %127 = arith.index_cast %126 : i32 to index
    %128 = memref.load %arg1[%127] : memref<8xi32, #tpu.memory_space<smem>>
    %129 = arith.index_cast %128 : i32 to index
    %c0_36 = arith.constant 0 : index
    %130 = vector.load %arg5[%129, %c0_36] : memref<32x128xf32, #tpu.memory_space<vmem>>, vector<1x128xf32>
    %131 = arith.index_cast %c5_i32 : i32 to index
    %c0_37 = arith.constant 0 : index
    %132 = vector.load %arg8[%131, %c0_37] : memref<8x512xf32, #tpu.memory_space<vmem>>, vector<1x128xf32>
    tpu.vector_store %arg8[%131, %c0_37], %130 {strides = array<i32>} : memref<8x512xf32, #tpu.memory_space<vmem>>, vector<1x128xf32>,
    %133 = arith.index_cast %126 : i32 to index
    %134 = memref.load %arg2[%133] : memref<8xi32, #tpu.memory_space<smem>>
    %135 = arith.index_cast %134 : i32 to index
    %c0_38 = arith.constant 0 : index
    %136 = vector.load %arg6[%135, %c0_38] : memref<8x128xf32, #tpu.memory_space<vmem>>, vector<1x128xf32>
    %137 = arith.index_cast %c5_i32 : i32 to index
    %c128_39 = arith.constant 128 : index
    %138 = vector.load %arg8[%137, %c128_39] : memref<8x512xf32, #tpu.memory_space<vmem>>, vector<1x128xf32>
    tpu.vector_store %arg8[%137, %c128_39], %136 {strides = array<i32>} : memref<8x512xf32, #tpu.memory_space<vmem>>, vector<1x128xf32>,
    %139 = arith.index_cast %126 : i32 to index
    %140 = memref.load %arg3[%139] : memref<8xi32, #tpu.memory_space<smem>>
    %141 = arith.index_cast %140 : i32 to index
    %c0_40 = arith.constant 0 : index
    %142 = vector.load %arg5[%141, %c0_40] : memref<32x128xf32, #tpu.memory_space<vmem>>, vector<1x128xf32>
    %143 = arith.index_cast %c5_i32 : i32 to index
    %c256_41 = arith.constant 256 : index
    %144 = vector.load %arg8[%143, %c256_41] : memref<8x512xf32, #tpu.memory_space<vmem>>, vector<1x128xf32>
    tpu.vector_store %arg8[%143, %c256_41], %142 {strides = array<i32>} : memref<8x512xf32, #tpu.memory_space<vmem>>, vector<1x128xf32>,
    %145 = arith.index_cast %126 : i32 to index
    %146 = memref.load %arg4[%145] : memref<8xi32, #tpu.memory_space<smem>>
    %147 = arith.index_cast %146 : i32 to index
    %c0_42 = arith.constant 0 : index
    %148 = vector.load %arg7[%147, %c0_42] : memref<16x128xf32, #tpu.memory_space<vmem>>, vector<1x128xf32>
    %149 = arith.index_cast %c5_i32 : i32 to index
    %c384_43 = arith.constant 384 : index
    %150 = vector.load %arg8[%149, %c384_43] : memref<8x512xf32, #tpu.memory_space<vmem>>, vector<1x128xf32>
    tpu.vector_store %arg8[%149, %c384_43], %148 {strides = array<i32>} : memref<8x512xf32, #tpu.memory_space<vmem>>, vector<1x128xf32>,
    %c6_i32 = arith.constant 6 : i32
    %151 = arith.addi %0, %c6_i32 : i32
    %152 = arith.index_cast %151 : i32 to index
    %153 = memref.load %arg1[%152] : memref<8xi32, #tpu.memory_space<smem>>
    %154 = arith.index_cast %153 : i32 to index
    %c0_44 = arith.constant 0 : index
    %155 = vector.load %arg5[%154, %c0_44] : memref<32x128xf32, #tpu.memory_space<vmem>>, vector<1x128xf32>
    %156 = arith.index_cast %c6_i32 : i32 to index
    %c0_45 = arith.constant 0 : index
    %157 = vector.load %arg8[%156, %c0_45] : memref<8x512xf32, #tpu.memory_space<vmem>>, vector<1x128xf32>
    tpu.vector_store %arg8[%156, %c0_45], %155 {strides = array<i32>} : memref<8x512xf32, #tpu.memory_space<vmem>>, vector<1x128xf32>,
    %158 = arith.index_cast %151 : i32 to index
    %159 = memref.load %arg2[%158] : memref<8xi32, #tpu.memory_space<smem>>
    %160 = arith.index_cast %159 : i32 to index
    %c0_46 = arith.constant 0 : index
    %161 = vector.load %arg6[%160, %c0_46] : memref<8x128xf32, #tpu.memory_space<vmem>>, vector<1x128xf32>
    %162 = arith.index_cast %c6_i32 : i32 to index
    %c128_47 = arith.constant 128 : index
    %163 = vector.load %arg8[%162, %c128_47] : memref<8x512xf32, #tpu.memory_space<vmem>>, vector<1x128xf32>
    tpu.vector_store %arg8[%162, %c128_47], %161 {strides = array<i32>} : memref<8x512xf32, #tpu.memory_space<vmem>>, vector<1x128xf32>,
    %164 = arith.index_cast %151 : i32 to index
    %165 = memref.load %arg3[%164] : memref<8xi32, #tpu.memory_space<smem>>
    %166 = arith.index_cast %165 : i32 to index
    %c0_48 = arith.constant 0 : index
    %167 = vector.load %arg5[%166, %c0_48] : memref<32x128xf32, #tpu.memory_space<vmem>>, vector<1x128xf32>
    %168 = arith.index_cast %c6_i32 : i32 to index
    %c256_49 = arith.constant 256 : index
    %169 = vector.load %arg8[%168, %c256_49] : memref<8x512xf32, #tpu.memory_space<vmem>>, vector<1x128xf32>
    tpu.vector_store %arg8[%168, %c256_49], %167 {strides = array<i32>} : memref<8x512xf32, #tpu.memory_space<vmem>>, vector<1x128xf32>,
    %170 = arith.index_cast %151 : i32 to index
    %171 = memref.load %arg4[%170] : memref<8xi32, #tpu.memory_space<smem>>
    %172 = arith.index_cast %171 : i32 to index
    %c0_50 = arith.constant 0 : index
    %173 = vector.load %arg7[%172, %c0_50] : memref<16x128xf32, #tpu.memory_space<vmem>>, vector<1x128xf32>
    %174 = arith.index_cast %c6_i32 : i32 to index
    %c384_51 = arith.constant 384 : index
    %175 = vector.load %arg8[%174, %c384_51] : memref<8x512xf32, #tpu.memory_space<vmem>>, vector<1x128xf32>
    tpu.vector_store %arg8[%174, %c384_51], %173 {strides = array<i32>} : memref<8x512xf32, #tpu.memory_space<vmem>>, vector<1x128xf32>,
    %c7_i32 = arith.constant 7 : i32
    %176 = arith.addi %0, %c7_i32 : i32
    %177 = arith.index_cast %176 : i32 to index
    %178 = memref.load %arg1[%177] : memref<8xi32, #tpu.memory_space<smem>>
    %179 = arith.index_cast %178 : i32 to index
    %c0_52 = arith.constant 0 : index
    %180 = vector.load %arg5[%179, %c0_52] : memref<32x128xf32, #tpu.memory_space<vmem>>, vector<1x128xf32>
    %181 = arith.index_cast %c7_i32 : i32 to index
    %c0_53 = arith.constant 0 : index
    %182 = vector.load %arg8[%181, %c0_53] : memref<8x512xf32, #tpu.memory_space<vmem>>, vector<1x128xf32>
    tpu.vector_store %arg8[%181, %c0_53], %180 {strides = array<i32>} : memref<8x512xf32, #tpu.memory_space<vmem>>, vector<1x128xf32>,
    %183 = arith.index_cast %176 : i32 to index
    %184 = memref.load %arg2[%183] : memref<8xi32, #tpu.memory_space<smem>>
    %185 = arith.index_cast %184 : i32 to index
    %c0_54 = arith.constant 0 : index
    %186 = vector.load %arg6[%185, %c0_54] : memref<8x128xf32, #tpu.memory_space<vmem>>, vector<1x128xf32>
    %187 = arith.index_cast %c7_i32 : i32 to index
    %c128_55 = arith.constant 128 : index
    %188 = vector.load %arg8[%187, %c128_55] : memref<8x512xf32, #tpu.memory_space<vmem>>, vector<1x128xf32>
    tpu.vector_store %arg8[%187, %c128_55], %186 {strides = array<i32>} : memref<8x512xf32, #tpu.memory_space<vmem>>, vector<1x128xf32>,
    %189 = arith.index_cast %176 : i32 to index
    %190 = memref.load %arg3[%189] : memref<8xi32, #tpu.memory_space<smem>>
    %191 = arith.index_cast %190 : i32 to index
    %c0_56 = arith.constant 0 : index
    %192 = vector.load %arg5[%191, %c0_56] : memref<32x128xf32, #tpu.memory_space<vmem>>, vector<1x128xf32>
    %193 = arith.index_cast %c7_i32 : i32 to index
    %c256_57 = arith.constant 256 : index
    %194 = vector.load %arg8[%193, %c256_57] : memref<8x512xf32, #tpu.memory_space<vmem>>, vector<1x128xf32>
    tpu.vector_store %arg8[%193, %c256_57], %192 {strides = array<i32>} : memref<8x512xf32, #tpu.memory_space<vmem>>, vector<1x128xf32>,
    %195 = arith.index_cast %176 : i32 to index
    %196 = memref.load %arg4[%195] : memref<8xi32, #tpu.memory_space<smem>>
    %197 = arith.index_cast %196 : i32 to index
    %c0_58 = arith.constant 0 : index
    %198 = vector.load %arg7[%197, %c0_58] : memref<16x128xf32, #tpu.memory_space<vmem>>, vector<1x128xf32>
    %199 = arith.index_cast %c7_i32 : i32 to index
    %c384_59 = arith.constant 384 : index
    %200 = vector.load %arg8[%199, %c384_59] : memref<8x512xf32, #tpu.memory_space<vmem>>, vector<1x128xf32>
    tpu.vector_store %arg8[%199, %c384_59], %198 {strides = array<i32>} : memref<8x512xf32, #tpu.memory_space<vmem>>, vector<1x128xf32>,
    %c8_i32_60 = arith.constant 8 : i32
    return
  }
  func.func @transform_0(%arg0: i32, %arg1: memref<8xi32, #tpu.memory_space<smem>>, %arg2: memref<8xi32, #tpu.memory_space<smem>>, %arg3: memref<8xi32, #tpu.memory_space<smem>>, %arg4: memref<8xi32, #tpu.memory_space<smem>>) -> (i32, i32) {
    %c0_i32 = arith.constant 0 : i32
    %c0_i32_0 = arith.constant 0 : i32
    %c0_i32_1 = arith.constant 0 : i32
    return %c0_i32, %c0_i32_0 : i32, i32
  }
  func.func @transform_1(%arg0: i32, %arg1: memref<8xi32, #tpu.memory_space<smem>>, %arg2: memref<8xi32, #tpu.memory_space<smem>>, %arg3: memref<8xi32, #tpu.memory_space<smem>>, %arg4: memref<8xi32, #tpu.memory_space<smem>>) -> (i32, i32) {
    %c0_i32 = arith.constant 0 : i32
    %c0_i32_0 = arith.constant 0 : i32
    %c0_i32_1 = arith.constant 0 : i32
    return %c0_i32, %c0_i32_0 : i32, i32
  }
  func.func @transform_2(%arg0: i32, %arg1: memref<8xi32, #tpu.memory_space<smem>>, %arg2: memref<8xi32, #tpu.memory_space<smem>>, %arg3: memref<8xi32, #tpu.memory_space<smem>>, %arg4: memref<8xi32, #tpu.memory_space<smem>>) -> (i32, i32) {
    %c0_i32 = arith.constant 0 : i32
    %c0_i32_0 = arith.constant 0 : i32
    %c0_i32_1 = arith.constant 0 : i32
    return %c0_i32, %c0_i32_0 : i32, i32
  }
  func.func @transform_3(%arg0: i32, %arg1: memref<8xi32, #tpu.memory_space<smem>>, %arg2: memref<8xi32, #tpu.memory_space<smem>>, %arg3: memref<8xi32, #tpu.memory_space<smem>>, %arg4: memref<8xi32, #tpu.memory_space<smem>>) -> (i32, i32) {
    %c0_i32 = arith.constant 0 : i32
    %c0_i32_0 = arith.constant 0 : i32
    return %arg0, %c0_i32 : i32, i32
  }
}

</mosaic_0001>

<bundles_post_ra>
// kernel: tpu_custom_call.1
= control target key start
LH: loop header
LB: loop body
LE: loop exit
PB: predicated region body
PF: predicated region fallthrough
CT: control target
= control target key end

     0   :  { %s463_s30 = smov [#allocation3]   ;;  %s464_s8 = smov [#allocation4]   ;;  %s537_s0 = inlined_call_operand.hbm [shape: s32[8], index: 0, kind: input, shape index: {}]   ;;  %s538_s4 = inlined_call_operand.hbm [shape: f32[32,128], index: 4, kind: input, shape index: {}]   ;;  %s539_s5 = inlined_call_operand.hbm [shape: f32[8,128], index: 5, kind: input, shape index: {}]   ;;  %s540_s6 = inlined_call_operand.hbm [shape: f32[16,128], index: 6, kind: input, shape index: {}]   ;;  %s541_s7 = inlined_call_operand.hbm [shape: f32[8,512], index: 7, kind: output, shape index: {}]   ;;  %s542_s1 = inlined_call_operand.hbm [shape: s32[8], index: 1, kind: input, shape index: {}]   ;;  %s543_s2 = inlined_call_operand.vmem [shape: s32[8], index: 2, kind: input, shape index: {}]   ;;  %s544_s3 = inlined_call_operand.vmem [shape: s32[8], index: 3, kind: input, shape index: {}]  }
   0x1   :  { %s13_s26 = sshll.u32 %s537_s0, 4  ;;  %s18_s29 = sshll.u32 %s542_s1, 4  ;;  %s14_s26 = int_to_ptr.hbm [resolvable:$true] %s13_s26  ;;  %s19_s29 = int_to_ptr.hbm [resolvable:$true] %s18_s29 }
   0x2   :  { %16 = dma.hbm_to_smem %s14_s26, 16, %s463_s30, [#allocation2] }
   0x3   :  { %21 = dma.hbm_to_smem %s19_s29, 16, %s464_s8, [#allocation2] }
   0x4   :  { %s23_s11 = sshll.u32 %s543_s2, 4  ;;  %s28_s14 = sshll.u32 %s544_s3, 4  ;;  %s24_s11 = int_to_ptr.vmem [resolvable:$true] %s23_s11  ;;  %s29_s14 = int_to_ptr.vmem [resolvable:$true] %s28_s14 }
   0x5   :  { %s465_s0 = smov [#allocation5]   ;;  %s466_s15 = smov [#allocation6]  }
   0x6   :  { %26 = dma.vmem_to_smem %s24_s11, 16, %s465_s0, [#allocation2] }
   0x7   :  { %31 = dma.vmem_to_smem %s29_s14, 16, %s466_s15, [#allocation2] }
   0x8   :  { %455 = dma.done.wait [#allocation2], 64 }
   0x9   :  { %456 = vsyncadd [#allocation2], 4294967232 }
   0xa   :  { %34 = sfence }
   0xb   :  { %35 = vsyncpa [#allocation8], 0 }
   0xc   :  { %36 = vsyncpa [#allocation11], 0  ;;  %s56_s17 = sshll.u32 %s539_s5, 4  ;;  %s57_s17 = int_to_ptr.hbm [resolvable:$true] %s56_s17 }
   0xd   :  { %37 = vsyncpa [#allocation9], 0  ;;  %s467_s2 = smov [#allocation10]   ;;  %s42_s20 = sshll.u32 %s538_s4, 4  ;;  %s43_s20 = int_to_ptr.hbm [resolvable:$true] %s42_s20 }
   0xe   :  { %s58_s18 = sshll.u32 %s467_s2, 4  ;;  %s468_s21 = smov [#allocation7]   ;;  %s59_s18 = int_to_ptr.vmem [resolvable:$true] %s58_s18 }
   0xf   :  { %61 = dma.hbm_to_vmem [thread:$0]  %s57_s17, 128, %s59_s18, [#allocation11]  }
  0x10   :  { %s44_s22 = sshll.u32 %s468_s21, 4  ;;  %s469_s23 = smov 128   ;;  %s45_s22 = int_to_ptr.vmem [resolvable:$true] %s44_s22 }
  0x11   :  { %s470_s24 = smov 8   ;;  %s66_s5 = sshll.u32 %s540_s6, 4  ;;  %s67_s5 = int_to_ptr.hbm [resolvable:$true] %s66_s5 }
  0x12   :  { %50 = dma.hbm_to_vmem [thread:$0]  %s43_s20, 512, %s45_s22, [#allocation8], %s469_s23, %s469_s23, %s470_s24  }
  0x13   :  { %s471_s27 = smov [#allocation12]  }
  0x14   :  { %s68_s28 = sshll.u32 %s471_s27, 4  ;;  %s69_s28 = int_to_ptr.vmem [resolvable:$true] %s68_s28 }
  0x15   :  { %74 = dma.hbm_to_vmem [thread:$0]  %s67_s5, 256, %s69_s28, [#allocation11], %s469_s23, %s469_s23, %s470_s24  }
  0x16   :  { %457 = dma.done.wait [#allocation8], 512  }
  0x17   :  { %458 = vsyncadd [#allocation8], 4294966784 }
  0x18   :  { %459 = dma.done.wait [#allocation11], 384  }
  0x19   :  { %460 = vsyncadd [#allocation11], 4294966912  ;;  %s88_s4 = sld [smem:[#allocation3]] }
  0x1a   :  { %s92_s29 = sld [smem:[#allocation4]] }
  0x1b   :  { %s96_s30 = sld [smem:[#allocation5]] }
  0x1c   :  { %s100_s8 = sld [smem:[#allocation6]] }
  0x1d   :  { %s273_s9 = sld [smem:[#allocation3 + $0x1]] }
  0x1e   :  { %s274_s10 = sld [smem:[#allocation4 + $0x1]] }
  0x1f   :  { %s275_s11 = sld [smem:[#allocation5 + $0x1]]  ;;  %s89_s12 = scalar_lea.vmem [#allocation7], %s88_s4 }
  0x20   :  { %v90_v0 = vld [vmem:[%s89_s12] sm:$0x1]  ;;  %s276_s13 = sld [smem:[#allocation6 + $0x1]]  ;;  %s93_s6 = scalar_lea.vmem [#allocation10], %s92_s29 }
  0x21   :  { %91 = vst [vmem:[#allocation13] sm:$0x1] %v90_v0  ;;  %v94_v1 = vld [vmem:[%s93_s6] sm:$0x1]  ;;  %s97_s14 = scalar_lea.vmem [#allocation7], %s96_s30  ;;  %s277_s2 = sld [smem:[#allocation3 + $0x2]] }
  0x22   :  { %95 = vst [vmem:[#allocation13 + $0x8] sm:$0x1] %v94_v1  ;;  %v98_v2 = vld [vmem:[%s97_s14] sm:$0x1]  ;;  %s101_s0 = scalar_lea.vmem [#allocation12], %s100_s8  ;;  %s278_s18 = sld [smem:[#allocation4 + $0x2]] }
  0x23   :  { %99 = vst [vmem:[#allocation13 + $0x10] sm:$0x1] %v98_v2  ;;  %v102_v3 = vld [vmem:[%s101_s0] sm:$0x1]  ;;  %s106_s15 = scalar_lea.vmem [#allocation7], %s273_s9  ;;  %s279_s3 = sld [smem:[#allocation5 + $0x2]] }
  0x24   :  { %103 = vst [vmem:[#allocation13 + $0x18] sm:$0x1] %v102_v3  ;;  %v107_v4 = vld [vmem:[%s106_s15] sm:$0x1]  ;;  %s110_s1 = scalar_lea.vmem [#allocation10], %s274_s10  ;;  %s280_s19 = sld [smem:[#allocation6 + $0x2]] }
  0x25   :  { %108 = vst [vmem:[#allocation13 + $0x1] sm:$0x1] %v107_v4  ;;  %v111_v5 = vld [vmem:[%s110_s1] sm:$0x1]  ;;  %s114_s16 = scalar_lea.vmem [#allocation7], %s275_s11  ;;  %s281_s20 = sld [smem:[#allocation3 + $0x3]] }
  0x26   :  { %112 = vst [vmem:[#allocation13 + $0x9] sm:$0x1] %v111_v5  ;;  %v115_v6 = vld [vmem:[%s114_s16] sm:$0x1]  ;;  %s118_s17 = scalar_lea.vmem [#allocation12], %s276_s13  ;;  %s282_s21 = sld [smem:[#allocation4 + $0x3]] }
  0x27   :  { %116 = vst [vmem:[#allocation13 + $0x11] sm:$0x1] %v115_v6  ;;  %v119_v7 = vld [vmem:[%s118_s17] sm:$0x1]  ;;  %s283_s22 = sld [smem:[#allocation5 + $0x3]]  ;;  %s123_s23 = scalar_lea.vmem [#allocation7], %s277_s2 }
  0x28   :  { %120 = vst [vmem:[#allocation13 + $0x19] sm:$0x1] %v119_v7  ;;  %v124_v8 = vld [vmem:[%s123_s23] sm:$0x1]  ;;  %s284_s24 = sld [smem:[#allocation6 + $0x3]]  ;;  %s127_s25 = scalar_lea.vmem [#allocation10], %s278_s18 }
  0x29   :  { %125 = vst [vmem:[#allocation13 + $0x2] sm:$0x1] %v124_v8  ;;  %v128_v9 = vld [vmem:[%s127_s25] sm:$0x1]  ;;  %s131_s26 = scalar_lea.vmem [#allocation7], %s279_s3  ;;  %s285_s30 = sld [smem:[#allocation3 + $0x4]] }
  0x2a   :  { %129 = vst [vmem:[#allocation13 + $0xa] sm:$0x1] %v128_v9  ;;  %v132_v10 = vld [vmem:[%s131_s26] sm:$0x1]  ;;  %s135_s5 = scalar_lea.vmem [#allocation12], %s280_s19  ;;  %s286_s8 = sld [smem:[#allocation4 + $0x4]] }
  0x2b   :  { %133 = vst [vmem:[#allocation13 + $0x12] sm:$0x1] %v132_v10  ;;  %v136_v11 = vld [vmem:[%s135_s5] sm:$0x1]  ;;  %s140_s27 = scalar_lea.vmem [#allocation7], %s281_s20  ;;  %s287_s9 = sld [smem:[#allocation5 + $0x4]] }
  0x2c   :  { %137 = vst [vmem:[#allocation13 + $0x1a] sm:$0x1] %v136_v11  ;;  %v141_v12 = vld [vmem:[%s140_s27] sm:$0x1]  ;;  %s144_s28 = scalar_lea.vmem [#allocation10], %s282_s21  ;;  %s288_s10 = sld [smem:[#allocation6 + $0x4]] }
  0x2d   :  { %142 = vst [vmem:[#allocation13 + $0x3] sm:$0x1] %v141_v12  ;;  %v145_v13 = vld [vmem:[%s144_s28] sm:$0x1]  ;;  %s148_s4 = scalar_lea.vmem [#allocation7], %s283_s22  ;;  %s289_s11 = sld [smem:[#allocation3 + $0x5]] }
  0x2e   :  { %146 = vst [vmem:[#allocation13 + $0xb] sm:$0x1] %v145_v13  ;;  %v149_v14 = vld [vmem:[%s148_s4] sm:$0x1]  ;;  %s152_s29 = scalar_lea.vmem [#allocation12], %s284_s24  ;;  %s290_s12 = sld [smem:[#allocation4 + $0x5]] }
  0x2f   :  { %150 = vst [vmem:[#allocation13 + $0x13] sm:$0x1] %v149_v14  ;;  %v153_v15 = vld [vmem:[%s152_s29] sm:$0x1]  ;;  %s291_s13 = sld [smem:[#allocation5 + $0x5]]  ;;  %s157_s6 = scalar_lea.vmem [#allocation7], %s285_s30 }
  0x30   :  { %154 = vst [vmem:[#allocation13 + $0x1b] sm:$0x1] %v153_v15  ;;  %v158_v16 = vld [vmem:[%s157_s6] sm:$0x1]  ;;  %s292_s14 = sld [smem:[#allocation6 + $0x5]]  ;;  %s161_s0 = scalar_lea.vmem [#allocation10], %s286_s8 }
  0x31   :  { %159 = vst [vmem:[#allocation13 + $0x4] sm:$0x1] %v158_v16  ;;  %v162_v17 = vld [vmem:[%s161_s0] sm:$0x1]  ;;  %s165_s15 = scalar_lea.vmem [#allocation7], %s287_s9  ;;  %s293_s3 = sld [smem:[#allocation3 + $0x6]] }
  0x32   :  { %163 = vst [vmem:[#allocation13 + $0xc] sm:$0x1] %v162_v17  ;;  %v166_v18 = vld [vmem:[%s165_s15] sm:$0x1]  ;;  %s169_s1 = scalar_lea.vmem [#allocation12], %s288_s10  ;;  %s294_s19 = sld [smem:[#allocation4 + $0x6]] }
  0x33   :  { %167 = vst [vmem:[#allocation13 + $0x14] sm:$0x1] %v166_v18  ;;  %v170_v19 = vld [vmem:[%s169_s1] sm:$0x1]  ;;  %s174_s16 = scalar_lea.vmem [#allocation7], %s289_s11  ;;  %s295_s20 = sld [smem:[#allocation5 + $0x6]] }
  0x34   :  { %171 = vst [vmem:[#allocation13 + $0x1c] sm:$0x1] %v170_v19  ;;  %v175_v20 = vld [vmem:[%s174_s16] sm:$0x1]  ;;  %s178_s17 = scalar_lea.vmem [#allocation10], %s290_s12  ;;  %s296_s21 = sld [smem:[#allocation6 + $0x6]] }
  0x35   :  { %176 = vst [vmem:[#allocation13 + $0x5] sm:$0x1] %v175_v20  ;;  %v179_v21 = vld [vmem:[%s178_s17] sm:$0x1]  ;;  %s182_s2 = scalar_lea.vmem [#allocation7], %s291_s13  ;;  %s297_s22 = sld [smem:[#allocation3 + $0x7]] }
  0x36   :  { %180 = vst [vmem:[#allocation13 + $0xd] sm:$0x1] %v179_v21  ;;  %v183_v22 = vld [vmem:[%s182_s2] sm:$0x1]  ;;  %s186_s18 = scalar_lea.vmem [#allocation12], %s292_s14  ;;  %s298_s23 = sld [smem:[#allocation4 + $0x7]] }
  0x37   :  { %184 = vst [vmem:[#allocation13 + $0x15] sm:$0x1] %v183_v22  ;;  %v187_v23 = vld [vmem:[%s186_s18] sm:$0x1]  ;;  %s299_s24 = sld [smem:[#allocation5 + $0x7]]  ;;  %s191_s25 = scalar_lea.vmem [#allocation7], %s293_s3 }
  0x38   :  { %188 = vst [vmem:[#allocation13 + $0x1d] sm:$0x1] %v187_v23  ;;  %v192_v24 = vld [vmem:[%s191_s25] sm:$0x1]  ;;  %s300_s26 = sld [smem:[#allocation6 + $0x7]]  ;;  %s195_s5 = scalar_lea.vmem [#allocation10], %s294_s19 }
  0x39   :  { %193 = vst [vmem:[#allocation13 + $0x6] sm:$0x1] %v192_v24  ;;  %v196_v25 = vld [vmem:[%s195_s5] sm:$0x1]  ;;  %s199_s27 = scalar_lea.vmem [#allocation7], %s295_s20  ;;  %s472_s28 = smov [#allocation13]  }
  0x3a   :  { %197 = vst [vmem:[#allocation13 + $0xe] sm:$0x1] %v196_v25  ;;  %v200_v26 = vld [vmem:[%s199_s27] sm:$0x1]  ;;  %s228_s4 = sshll.u32 %s472_s28, 4  ;;  %s203_s29 = scalar_lea.vmem [#allocation12], %s296_s21  ;;  %s229_s4 = int_to_ptr.vmem [resolvable:$true] %s228_s4 }
  0x3b   :  { %201 = vst [vmem:[#allocation13 + $0x16] sm:$0x1] %v200_v26  ;;  %v204_v27 = vld [vmem:[%s203_s29] sm:$0x1]  ;;  %s230_s9 = sshll.u32 %s541_s7, 4  ;;  %s208_s10 = scalar_lea.vmem [#allocation7], %s297_s22  ;;  %s231_s9 = int_to_ptr.hbm [resolvable:$true] %s230_s9 }
  0x3c   :  { %205 = vst [vmem:[#allocation13 + $0x1e] sm:$0x1] %v204_v27  ;;  %v209_v28 = vld [vmem:[%s208_s10] sm:$0x1]  ;;  %s212_s11 = scalar_lea.vmem [#allocation10], %s298_s23 }
  0x3d   :  { %210 = vst [vmem:[#allocation13 + $0x7] sm:$0x1] %v209_v28  ;;  %v213_v29 = vld [vmem:[%s212_s11] sm:$0x1]  ;;  %s216_s12 = scalar_lea.vmem [#allocation7], %s299_s24 }
  0x3e   :  { %214 = vst [vmem:[#allocation13 + $0xf] sm:$0x1] %v213_v29  ;;  %v217_v30 = vld [vmem:[%s216_s12] sm:$0x1]  ;;  %s220_s13 = scalar_lea.vmem [#allocation12], %s300_s26 }
  0x3f   :  { %218 = vst [vmem:[#allocation13 + $0x17] sm:$0x1] %v217_v30  ;;  %v221_v31 = vld [vmem:[%s220_s13] sm:$0x1] }
  0x40   :  { %222 = vst [vmem:[#allocation13 + $0x1f] sm:$0x1] %v221_v31 }
  0x41   :  { %233 = dma.vmem_to_hbm [thread:$0]  %s229_s4, 512, %s231_s9, [#allocation9]  }
  0x42   :  { %461 = dma.done.wait [#allocation9], 512  }
  0x43   :  { %462 = vsyncadd [#allocation9], 4294966784 }
  0x44   :  { %238 = vsyncpa [#allocation8], 1 }
  0x45   :  { %239 = vsyncpa [#allocation11], 1 }
  0x46   :  { %240 = vsyncpa [#allocation9], 1 }

</bundles_post_ra>
